<compile_context>
chip_gen: v7x
topology: tpu7x:2x2x1
jax: 0.10.0
libtpu: 0.0.40
codegen_flags: <defaults>
</compile_context>

<pallas_src>
import functools

import jax
import jax.numpy as jnp
from jax.experimental import pallas as pl
from jax.experimental.pallas import tpu as pltpu


# ----------------------------------------------------------------------------
# Fused kernel: (gated) 1x1 conv as matmul + shifted BN batch stats + BN apply.
# Grid iterates over tiles of (padded) P. Output block (Cout, P_pad) is
# resident in VMEM for the whole grid; stats accumulate in VMEM scratch.
# ----------------------------------------------------------------------------
def fused_se_conv_bn_kernel(x_ref, w_ref, gamma_ref, beta_ref, o_ref,
                            sum_ref, sumsq_ref, k_ref,
                            *, tile_p, p_real, count, eps, has_pad):
    i = pl.program_id(0)
    n_tiles = pl.num_programs(0)

    # (Cout, Cmid) @ (Cmid, TP) -> (Cout, TP), f32 accumulation on the MXU.
    # SE gate is already folded into w_ref.
    y = jnp.dot(w_ref[...], x_ref[...], preferred_element_type=jnp.float32)

    @pl.when(i == 0)
    def _init():
        sum_ref[...] = jnp.zeros_like(sum_ref)
        sumsq_ref[...] = jnp.zeros_like(sumsq_ref)
        # Per-channel shift K ~ mean (estimated from the first tile) for a
        # numerically stable shifted-variance accumulation.
        k_ref[...] = jnp.sum(y, axis=1, keepdims=True) * jnp.float32(1.0 / tile_p)

    start = pl.multiple_of(i * tile_p, 128)
    o_ref[:, pl.ds(start, tile_p)] = y          # lane-aligned, unmasked store

    # Shifted per-channel batch statistics (XLU reduce, hidden under DMA).
    yc = y - k_ref[...]
    if has_pad:
        # Padded columns (y == 0 exactly) must not contribute (y - K) terms.
        col = start + jax.lax.broadcasted_iota(jnp.int32, (1, tile_p), 1)
        yc = jnp.where(col < p_real, yc, jnp.float32(0.0))
    sum_ref[...] += jnp.sum(yc, axis=1, keepdims=True)
    sumsq_ref[...] += jnp.sum(yc * yc, axis=1, keepdims=True)

    @pl.when(i == n_tiles - 1)
    def _epilogue():
        inv_count = jnp.float32(1.0 / count)
        dmean = sum_ref[...] * inv_count                       # E[y] - K
        mean = dmean + k_ref[...]                              # (Cout, 1)
        var = sumsq_ref[...] * inv_count - dmean * dmean       # biased variance
        scale = gamma_ref[...] * jax.lax.rsqrt(var + jnp.float32(eps))
        shift = beta_ref[...] - mean * scale
        o_ref[...] = o_ref[...] * scale + shift                # in-place BN apply


def _choose_tiling(p, max_tile_p=1024, target_steps=6):
    """tile_p: 128-multiple targeting ~target_steps grid steps (capped).

    Returns (tile_p, n_tiles, p_pad) with p_pad = n_tiles * tile_p >= p,
    p_pad a multiple of 128.  e.g. p=3136 -> (640, 5, 3200).
    """
    max_tile_p = max(128, (max_tile_p // 128) * 128)
    tile = -(-p // target_steps)                       # cdiv
    tile = ((tile + 127) // 128) * 128                 # round up to 128
    tile = min(tile, max_tile_p, ((p + 127) // 128) * 128)
    tile = max(tile, 128)
    n_tiles = -(-p // tile)
    return tile, n_tiles, n_tiles * tile


def module_forward(x124, x121, params, *, max_tile_p=1024, target_steps=6,
                   compute_dtype=jnp.float32):
    """x124: [1, Cse, 1, 1], x121: [1, Cmid, H, W] (NCHW). Returns [1, Cout, H, W] f32."""
    w1, b1, w2, gamma, beta, eps = (params["w1"], params["b1"], params["w2"],
                                    params["gamma"], params["beta"], params["eps"])
    n, cmid, h, w = x121.shape
    cse = x124.shape[1]
    cout = w2.shape[0]
    assert n == 1  # TODO(synk): batch>1 -> add leading "parallel" grid axis (v7x 2 TCs)
    p = h * w

    # --- tiny SE branch in plain JAX, folded into the conv weight -----------
    se = x124.reshape(cse).astype(jnp.float32)
    gate = jax.nn.sigmoid(w1.astype(jnp.float32) @ se + b1.astype(jnp.float32))
    w_eff = (w2.astype(jnp.float32) * gate[None, :]).astype(compute_dtype)  # (Cout, Cmid)

    # --- tiling + padding: multi-step grid so the big input DMA pipelines ---
    tile_p, n_tiles, p_pad = _choose_tiling(p, max_tile_p, target_steps)

    # channels-first flattened layout: pure reshape, no transpose
    x_cf = x121.reshape(cmid, p).astype(compute_dtype)
    if p_pad > p:
        x_cf = jnp.pad(x_cf, ((0, 0), (0, p_pad - p)))   # zero cols: stats-safe

    gamma_col = gamma.reshape(cout, 1).astype(jnp.float32)
    beta_col = beta.reshape(cout, 1).astype(jnp.float32)

    kernel = functools.partial(
        fused_se_conv_bn_kernel, tile_p=tile_p, p_real=p, count=float(p),
        eps=float(eps), has_pad=(p_pad > p))

    # Explicit VMEM budget: resident output + double-buffered input tile + weights.
    itemsize = jnp.dtype(compute_dtype).itemsize
    vmem_est = (cout * p_pad * 4                     # resident f32 output
                + 2 * cmid * tile_p * itemsize       # double-buffered input tile
                + 2 * cout * cmid * itemsize         # weights
                + 64 * 1024)                         # gamma/beta/scratch
    vmem_limit = int(min(64 * 1024 * 1024, max(16 * 1024 * 1024, 4 * vmem_est)))

    out_cf = pl.pallas_call(
        kernel,
        grid_spec=pltpu.PrefetchScalarGridSpec(
            num_scalar_prefetch=0,
            grid=(n_tiles,),
            in_specs=[
                pl.BlockSpec((cmid, tile_p), lambda i: (0, i)),   # x tile
                pl.BlockSpec((cout, cmid), lambda i: (0, 0)),     # folded conv weight
                pl.BlockSpec((cout, 1), lambda i: (0, 0)),        # gamma
                pl.BlockSpec((cout, 1), lambda i: (0, 0)),        # beta
            ],
            out_specs=pl.BlockSpec((cout, p_pad), lambda i: (0, 0)),  # resident output
            scratch_shapes=[pltpu.VMEM((cout, 1), jnp.float32),   # per-channel sum
                            pltpu.VMEM((cout, 1), jnp.float32),   # per-channel sumsq
                            pltpu.VMEM((cout, 1), jnp.float32)],  # per-channel shift K
        ),
        out_shape=jax.ShapeDtypeStruct((cout, p_pad), jnp.float32),
        compiler_params=pltpu.CompilerParams(
            dimension_semantics=("arbitrary",),
            vmem_limit_bytes=vmem_limit),
    )(x_cf, w_eff, gamma_col, beta_col)

    return out_cf[:, :p].reshape(n, cout, h, w)       # slice off pad, pure reshape


def reference_forward(x124, x121, params):
    """Pure-JAX reference mirroring the PyTorch module (training-mode BN)."""
    w1, b1, w2, gamma, beta, eps = (params["w1"], params["b1"], params["w2"],
                                    params["gamma"], params["beta"], params["eps"])
    cse = x124.shape[1]
    se = x124.reshape(cse)
    x125 = w1 @ se + b1                                      # (Cmid,)
    x126 = jax.nn.sigmoid(x125)
    x127 = x121 * x126.reshape(1, -1, 1, 1)                  # broadcast over H, W
    x128 = jnp.einsum("nchw,oc->nohw", x127, w2)             # 1x1 conv, no bias
    mean = jnp.mean(x128, axis=(0, 2, 3), keepdims=True)
    var = jnp.var(x128, axis=(0, 2, 3), keepdims=True)       # biased
    xn = (x128 - mean) * jax.lax.rsqrt(var + eps)
    return xn * gamma.reshape(1, -1, 1, 1) + beta.reshape(1, -1, 1, 1)


if __name__ == "__main__":
    # Keep the channel structure of the module (12 -> 288 -> 48); shrink 56 -> 16/18.
    CSE, CMID, COUT = 12, 288, 48

    key = jax.random.PRNGKey(0)
    k1, k2, k3, k4, k5, k6 = jax.random.split(key, 6)

    x124 = jax.random.normal(k1, (1, CSE, 1, 1), dtype=jnp.float32)

    params = {
        # Torch layout: Conv2d(12->288) weight (Cmid, Cse), bias (Cmid,);
        # Conv2d(288->48, no bias) weight (Cout, Cmid).
        "w1": 0.1 * jax.random.normal(k3, (CMID, CSE), dtype=jnp.float32),
        "b1": 0.05 * jax.random.normal(k4, (CMID,), dtype=jnp.float32),
        "w2": 0.05 * jax.random.normal(k5, (COUT, CMID), dtype=jnp.float32),
        "gamma": jnp.ones((COUT,), dtype=jnp.float32),       # BN affine defaults
        "beta": jnp.zeros((COUT,), dtype=jnp.float32),
        "eps": jnp.float32(1e-3),
    }

    # Case 1: 16x16 spatial (P = 256 = 2x128): multi-tile accumulate, no padding.
    x121_a = jax.random.normal(k2, (1, CMID, 16, 16), dtype=jnp.float32)
    ref_a = jax.block_until_ready(reference_forward(x124, x121_a, params))
    out_a = jax.block_until_ready(module_forward(x124, x121_a, params))
    assert out_a.shape == (1, COUT, 16, 16), out_a.shape
    assert jnp.allclose(out_a, ref_a, atol=1e-3, rtol=1e-3), float(
        jnp.max(jnp.abs(out_a - ref_a)))

    # Case 2: 18x18 spatial (P = 324, not a 128-multiple): zero-pad + masked-stats
    # path, the same path the real 56x56 (P = 3136 -> 5x640 = 3200) takes.
    x121_b = jax.random.normal(k6, (1, CMID, 18, 18), dtype=jnp.float32)
    ref_b = jax.block_until_ready(reference_forward(x124, x121_b, params))
    out_b = jax.block_until_ready(module_forward(x124, x121_b, params))
    assert out_b.shape == (1, COUT, 18, 18), out_b.shape
    assert jnp.allclose(out_b, ref_b, atol=1e-3, rtol=1e-3), float(
        jnp.max(jnp.abs(out_b - ref_b)))

    # Case 3: single padded tile (init + accumulate + epilogue on one grid step).
    out_c = jax.block_until_ready(
        module_forward(x124, x121_b, params, target_steps=1))
    assert jnp.allclose(out_c, ref_b, atol=1e-3, rtol=1e-3), float(
        jnp.max(jnp.abs(out_c - ref_b)))

    # Case 4: bf16 input/weight DMA (halves the dominant HBM read); numerics
    # differ from the f32 reference, so the tolerance is loosened.
    out_d = jax.block_until_ready(
        module_forward(x124, x121_b, params, compute_dtype=jnp.bfloat16))
    assert jnp.allclose(out_d, ref_b, atol=5e-2, rtol=5e-2), float(
        jnp.max(jnp.abs(out_d - ref_b)))

    print("KERNEL_OK")
</pallas_src>

<mosaic_0001>
module attributes {stable_mosaic.version = 11 : i64} {
  func.func @fused_se_conv_bn_kernel(%arg0: i32, %arg1: memref<288x128xf32, #tpu.memory_space<vmem>>, %arg2: memref<48x288xf32, #tpu.memory_space<vmem>>, %arg3: memref<48x1xf32, #tpu.memory_space<vmem>>, %arg4: memref<48x1xf32, #tpu.memory_space<vmem>>, %arg5: memref<48x256xf32, #tpu.memory_space<vmem>>, %arg6: memref<48x1xf32, #tpu.memory_space<vmem>>, %arg7: memref<48x1xf32, #tpu.memory_space<vmem>>, %arg8: memref<48x1xf32, #tpu.memory_space<vmem>>) attributes {dimension_semantics = [#tpu.dimension_semantics<arbitrary>], iteration_bounds = array<i64: 2>, scalar_prefetch = 0 : i64, scratch_operands = 3 : i64, tpu.core_type = #tpu.core_type<tc>, window_params = [{transform_indices = @transform_0, window_bounds = array<i64: 288, 128>}, {pipeline_mode = #tpu.pipeline_mode<synchronous>, transform_indices = @transform_1, window_bounds = array<i64: 48, 288>}, {pipeline_mode = #tpu.pipeline_mode<synchronous>, transform_indices = @transform_2, window_bounds = array<i64: 48, 1>}, {pipeline_mode = #tpu.pipeline_mode<synchronous>, transform_indices = @transform_3, window_bounds = array<i64: 48, 1>}, {pipeline_mode = #tpu.pipeline_mode<synchronous>, transform_indices = @transform_4, window_bounds = array<i64: 48, 256>}]} {
    %c0 = arith.constant 0 : index
    %c0_0 = arith.constant 0 : index
    %0 = vector.load %arg2[%c0, %c0_0] : memref<48x288xf32, #tpu.memory_space<vmem>>, vector<48x288xf32>
    %c0_1 = arith.constant 0 : index
    %c0_2 = arith.constant 0 : index
    %1 = vector.load %arg1[%c0_1, %c0_2] : memref<288x128xf32, #tpu.memory_space<vmem>>, vector<288x128xf32>
    %cst = arith.constant dense<0.000000e+00> : vector<48x128xf32>
    %2 = tpu.matmul %0, %1, %cst {dimension_numbers = #tpu.dot_dimension_numbers<[1], [0], [0], [1], [0, 0, 1, 1], [], []>} : vector<48x288xf32>, vector<288x128xf32>, vector<48x128xf32> -> vector<48x128xf32>
    %c0_i32 = arith.constant 0 : i32
    %3 = arith.cmpi eq, %arg0, %c0_i32 : i32
    %4 = arith.extui %3 : i1 to i32
    %c0_i32_3 = arith.constant 0 : i32
    %5 = arith.cmpi ne, %4, %c0_i32_3 : i32
    scf.if %5 {
      %cst_18 = arith.constant 0.000000e+00 : f32
      %27 = vector.broadcast %cst_18 : f32 to vector<48x1xf32>
      %c0_19 = arith.constant 0 : index
      %c0_20 = arith.constant 0 : index
      %28 = vector.load %arg6[%c0_19, %c0_20] : memref<48x1xf32, #tpu.memory_space<vmem>>, vector<48x1xf32>
      tpu.vector_store %arg6[%c0_19, %c0_20], %27 {strides = array<i32>} : memref<48x1xf32, #tpu.memory_space<vmem>>, vector<48x1xf32>,
      %cst_21 = arith.constant 0.000000e+00 : f32
      %29 = vector.broadcast %cst_21 : f32 to vector<48x1xf32>
      %c0_22 = arith.constant 0 : index
      %c0_23 = arith.constant 0 : index
      %30 = vector.load %arg7[%c0_22, %c0_23] : memref<48x1xf32, #tpu.memory_space<vmem>>, vector<48x1xf32>
      tpu.vector_store %arg7[%c0_22, %c0_23], %29 {strides = array<i32>} : memref<48x1xf32, #tpu.memory_space<vmem>>, vector<48x1xf32>,
      %cst_24 = arith.constant dense<0.000000e+00> : vector<48xf32>
      %31 = vector.multi_reduction <add>, %2, %cst_24 [1] : vector<48x128xf32> to vector<48xf32>
      %32 = vector.shape_cast %31 : vector<48xf32> to vector<48x1xf32>
      %cst_25 = arith.constant 7.812500e-03 : f32
      %33 = vector.broadcast %cst_25 : f32 to vector<48x1xf32>
      %34 = arith.mulf %32, %33 : vector<48x1xf32>
      %c0_26 = arith.constant 0 : index
      %c0_27 = arith.constant 0 : index
      %35 = vector.load %arg8[%c0_26, %c0_27] : memref<48x1xf32, #tpu.memory_space<vmem>>, vector<48x1xf32>
      tpu.vector_store %arg8[%c0_26, %c0_27], %34 {strides = array<i32>} : memref<48x1xf32, #tpu.memory_space<vmem>>, vector<48x1xf32>,
    } else {
    }
    %c128_i32 = arith.constant 128 : i32
    %6 = arith.muli %arg0, %c128_i32 : i32
    %7 = tpu.assume_multiple %6, 128 : i32
    %c0_4 = arith.constant 0 : index
    %8 = arith.index_cast %7 : i32 to index
    %9 = vector.load %arg5[%c0_4, %8] : memref<48x256xf32, #tpu.memory_space<vmem>>, vector<48x128xf32>
    tpu.vector_store %arg5[%c0_4, %8], %2 {strides = array<i32>} : memref<48x256xf32, #tpu.memory_space<vmem>>, vector<48x128xf32>,
    %c0_5 = arith.constant 0 : index
    %c0_6 = arith.constant 0 : index
    %10 = vector.load %arg8[%c0_5, %c0_6] : memref<48x1xf32, #tpu.memory_space<vmem>>, vector<48x1xf32>
    %11 = vector.broadcast %10 : vector<48x1xf32> to vector<48x128xf32>
    %12 = arith.subf %2, %11 : vector<48x128xf32>
    %c0_7 = arith.constant 0 : index
    %c0_8 = arith.constant 0 : index
    %13 = vector.load %arg6[%c0_7, %c0_8] : memref<48x1xf32, #tpu.memory_space<vmem>>, vector<48x1xf32>
    %cst_9 = arith.constant dense<0.000000e+00> : vector<48xf32>
    %14 = vector.multi_reduction <add>, %12, %cst_9 [1] : vector<48x128xf32> to vector<48xf32>
    %15 = vector.shape_cast %14 : vector<48xf32> to vector<48x1xf32>
    %16 = arith.addf %13, %15 : vector<48x1xf32>
    %c0_10 = arith.constant 0 : index
    %c0_11 = arith.constant 0 : index
    %17 = vector.load %arg6[%c0_10, %c0_11] : memref<48x1xf32, #tpu.memory_space<vmem>>, vector<48x1xf32>
    tpu.vector_store %arg6[%c0_10, %c0_11], %16 {strides = array<i32>} : memref<48x1xf32, #tpu.memory_space<vmem>>, vector<48x1xf32>,
    %c0_12 = arith.constant 0 : index
    %c0_13 = arith.constant 0 : index
    %18 = vector.load %arg7[%c0_12, %c0_13] : memref<48x1xf32, #tpu.memory_space<vmem>>, vector<48x1xf32>
    %19 = arith.mulf %12, %12 : vector<48x128xf32>
    %cst_14 = arith.constant dense<0.000000e+00> : vector<48xf32>
    %20 = vector.multi_reduction <add>, %19, %cst_14 [1] : vector<48x128xf32> to vector<48xf32>
    %21 = vector.shape_cast %20 : vector<48xf32> to vector<48x1xf32>
    %22 = arith.addf %18, %21 : vector<48x1xf32>
    %c0_15 = arith.constant 0 : index
    %c0_16 = arith.constant 0 : index
    %23 = vector.load %arg7[%c0_15, %c0_16] : memref<48x1xf32, #tpu.memory_space<vmem>>, vector<48x1xf32>
    tpu.vector_store %arg7[%c0_15, %c0_16], %22 {strides = array<i32>} : memref<48x1xf32, #tpu.memory_space<vmem>>, vector<48x1xf32>,
    %c1_i32 = arith.constant 1 : i32
    %24 = arith.cmpi eq, %arg0, %c1_i32 : i32
    %25 = arith.extui %24 : i1 to i32
    %c0_i32_17 = arith.constant 0 : i32
    %26 = arith.cmpi ne, %25, %c0_i32_17 : i32
    scf.if %26 {
      %c0_18 = arith.constant 0 : index
      %c0_19 = arith.constant 0 : index
      %27 = vector.load %arg6[%c0_18, %c0_19] : memref<48x1xf32, #tpu.memory_space<vmem>>, vector<48x1xf32>
      %cst_20 = arith.constant 3.906250e-03 : f32
      %28 = vector.broadcast %cst_20 : f32 to vector<48x1xf32>
      %29 = arith.mulf %27, %28 : vector<48x1xf32>
      %c0_21 = arith.constant 0 : index
      %c0_22 = arith.constant 0 : index
      %30 = vector.load %arg8[%c0_21, %c0_22] : memref<48x1xf32, #tpu.memory_space<vmem>>, vector<48x1xf32>
      %31 = arith.addf %29, %30 : vector<48x1xf32>
      %c0_23 = arith.constant 0 : index
      %c0_24 = arith.constant 0 : index
      %32 = vector.load %arg7[%c0_23, %c0_24] : memref<48x1xf32, #tpu.memory_space<vmem>>, vector<48x1xf32>
      %cst_25 = arith.constant 3.906250e-03 : f32
      %33 = vector.broadcast %cst_25 : f32 to vector<48x1xf32>
      %34 = arith.mulf %32, %33 : vector<48x1xf32>
      %35 = arith.mulf %29, %29 : vector<48x1xf32>
      %36 = arith.subf %34, %35 : vector<48x1xf32>
      %c0_26 = arith.constant 0 : index
      %c0_27 = arith.constant 0 : index
      %37 = vector.load %arg3[%c0_26, %c0_27] : memref<48x1xf32, #tpu.memory_space<vmem>>, vector<48x1xf32>
      %cst_28 = arith.constant 1.000000e-03 : f32
      %38 = vector.broadcast %cst_28 : f32 to vector<48x1xf32>
      %39 = arith.addf %36, %38 : vector<48x1xf32>
      %40 = math.rsqrt %39 : vector<48x1xf32>
      %41 = arith.mulf %37, %40 : vector<48x1xf32>
      %c0_29 = arith.constant 0 : index
      %c0_30 = arith.constant 0 : index
      %42 = vector.load %arg4[%c0_29, %c0_30] : memref<48x1xf32, #tpu.memory_space<vmem>>, vector<48x1xf32>
      %43 = arith.mulf %31, %41 : vector<48x1xf32>
      %44 = arith.subf %42, %43 : vector<48x1xf32>
      %c0_31 = arith.constant 0 : index
      %c0_32 = arith.constant 0 : index
      %45 = vector.load %arg5[%c0_31, %c0_32] : memref<48x256xf32, #tpu.memory_space<vmem>>, vector<48x256xf32>
      %46 = vector.broadcast %41 : vector<48x1xf32> to vector<48x256xf32>
      %47 = arith.mulf %45, %46 : vector<48x256xf32>
      %48 = vector.broadcast %44 : vector<48x1xf32> to vector<48x256xf32>
      %49 = arith.addf %47, %48 : vector<48x256xf32>
      %c0_33 = arith.constant 0 : index
      %c0_34 = arith.constant 0 : index
      %50 = vector.load %arg5[%c0_33, %c0_34] : memref<48x256xf32, #tpu.memory_space<vmem>>, vector<48x256xf32>
      tpu.vector_store %arg5[%c0_33, %c0_34], %49 {strides = array<i32>} : memref<48x256xf32, #tpu.memory_space<vmem>>, vector<48x256xf32>,
    } else {
    }
    return
  }
  func.func @transform_0(%arg0: i32) -> (i32, i32) {
    %c0_i32 = arith.constant 0 : i32
    %c0_i32_0 = arith.constant 0 : i32
    return %c0_i32, %arg0 : i32, i32
  }
  func.func @transform_1(%arg0: i32) -> (i32, i32) {
    %c0_i32 = arith.constant 0 : i32
    %c0_i32_0 = arith.constant 0 : i32
    %c0_i32_1 = arith.constant 0 : i32
    return %c0_i32, %c0_i32_0 : i32, i32
  }
  func.func @transform_2(%arg0: i32) -> (i32, i32) {
    %c0_i32 = arith.constant 0 : i32
    %c0_i32_0 = arith.constant 0 : i32
    %c0_i32_1 = arith.constant 0 : i32
    return %c0_i32, %c0_i32_0 : i32, i32
  }
  func.func @transform_3(%arg0: i32) -> (i32, i32) {
    %c0_i32 = arith.constant 0 : i32
    %c0_i32_0 = arith.constant 0 : i32
    %c0_i32_1 = arith.constant 0 : i32
    return %c0_i32, %c0_i32_0 : i32, i32
  }
  func.func @transform_4(%arg0: i32) -> (i32, i32) {
    %c0_i32 = arith.constant 0 : i32
    %c0_i32_0 = arith.constant 0 : i32
    %c0_i32_1 = arith.constant 0 : i32
    return %c0_i32, %c0_i32_0 : i32, i32
  }
}

</mosaic_0001>

<bundles_post_ra>
// kernel: tpu_custom_call.1
= control target key start
LH: loop header
LB: loop body
LE: loop exit
PB: predicated region body
PF: predicated region fallthrough
CT: control target
= control target key end

     0   :  { %9 = vsyncpa [#allocation6], 0  ;;  %s1635_s0 = inlined_call_operand.hbm [shape: f32[288,256], index: 0, kind: input, shape index: {}]   ;;  %s1636_s1 = inlined_call_operand.hbm [shape: f32[48,288], index: 1, kind: input, shape index: {}]   ;;  %s1637_s2 = inlined_call_operand.vmem [shape: f32[48,1], index: 2, kind: input, shape index: {}]   ;;  %s1638_s3 = inlined_call_operand.vmem [shape: f32[48,1], index: 3, kind: input, shape index: {}]   ;;  %s1639_s4 = inlined_call_operand.hbm [shape: f32[48,256], index: 4, kind: output, shape index: {}]  }
   0x1   :  { %11 = vsyncpa [#allocation6 + $0x1], 0 }
   0x2   :  { %12 = vsyncpa [#allocation9], 0 }
   0x3   :  { %13 = vsyncpa [#allocation7], 0  ;;  %s1304_s15 = smov 0   ;;  %s1306_s16 = smov 0  }
   0x4   :  { %s1308_s17 = smov 0   ;;  %s1310_s18 = smov 0  }
   0x5 LB: > { %s1323_s19 = sadd.s32 4294967295, %s1264_s18   ;;  %s1326_s20 = sadd.s32 1, %s1264_s18   ;;  %s1264_s18 = sphi %s1310_s18, %s1658_s18   ;;  %s1260_s17 = sphi %s1308_s17, %s1657_s17   ;;  %s1256_s16 = sphi %s1306_s16, %s1656_s16   ;;  %s1252_s15 = sphi %s1304_s15, %s1655_s15  }
   0x6   : > { %s23_s21 = ssub.s32 %s1264_s18, %s1326_s20  ;;  %s26_s22 = sadd.s32 1, %s1260_s17 }
   0x7   : > { %p24_p0 = scmp.eq.s32.totalorder %s23_s21, 0  ;;  %p33_p1 = scmp.ne.s32.totalorder %s1260_s17, %s1256_s16 }
   0x8   : > { %p34_p2 = scmp.eq.s32.totalorder %s1264_s18, 0  ;;  %p39_p3 = scmp.ne.s32.totalorder %s1256_s16, %s1252_s15 }
   0x9   : > { %s1336_s23 = scalar_select %p24_p0, %s1260_s17, %s26_s22  }
   0xa   : > { %p1338_p4 = por %p34_p2, %p33_p1  ;;  %p1640_p5 = scmp.eq.s32.totalorder %s1323_s19, 0 }
   0xb   : > { %p916_p6 = scmp.ge.s32.totalorder %s1264_s18, 1  ;;  %p134_p7 = scmp.lt.s32.totalorder %s1264_s18, 3 }
   0xc   : > { %p1347_p8 = por %p1640_p5, %p39_p3  ;;  %s1266_s27 = smov [#allocation8]  }
   0xd   : > { %p1352_p10 = pnand %p916_p6, %p134_p7  ;;  %s146_s28 = sshll.u32 %s1266_s27, 4  ;;  %s147_s28 = int_to_ptr.vmem [resolvable:$true] %s146_s28 }
   0xe   : > { %s1645_s25 = scalar_select %p1347_p8, 1, 0 }
   0xf   : > { %s1646_s26 = scalar_select %p1352_p10, 1, 0 }
  0x10   : > { %p1065_p11 = pneg %p1352_p10  ;;  %p1074_p13 = scmp.lt.s32.totalorder %s1264_s18, 2 }
  0x11   : > { %s166_s30 = sand.u32 1, %s1260_s17   ;;  %s919_s5 = sshll.u32 %s1264_s18, 7 }
  0x12   : > { %p1360_p12 = pnand %p1065_p11, %p1640_p5  ;;  %p1369_p0 = pnand %p1074_p13, %p1338_p4 }
  0x13   : > { %s1138_s9 = scalar_lea.hbm %s1636_s1, 2304 }
  0x14   : > { %s1648_s6 = scalar_select %p1369_p0, 1, 0 }
  0x15   : > { %p1139_p1 = scmp.ne.s32.totalorder %s1636_s1, %s1138_s9  ;;  %p1140_p2 = pneg %p1360_p12 }
  0x16   : > { %p1145_p7 = scmp.lt.u32.totalorder %s1138_s9, %s1636_s1 }
  0x17   : > { %p1141_p3 = pnand %p1140_p2, %p1139_p1 }
  0x19   : > { %p1142_p6 = pneg %p1141_p3 }
  0x1b   : > { %p1147_p4 = pnand %p1145_p7, %p1142_p6 }
  0x1d   : > { %1150 = shalt.err (!%p1147_p4)
}
  0x1e   : > { %s1151_s14 = scalar_lea.vmem %s147_s28, 2304  ;;  %p1159_p5 = scmp.lt.s32.totalorder %s147_s28, %s147_s28 }
  0x1f   : > { %p1152_p11 = scmp.ne.s32.totalorder %s147_s28, %s1151_s14  ;;  %p1160_p8 = scmp.lt.s32.totalorder %s1151_s14, %s1151_s14 }
  0x21   : > { %p1154_p13 = pnand %p1152_p11, %p1140_p2  ;;  %p1161_p10 = por %p1160_p8, %p1159_p5 }
  0x23   : > { %p1155_p9 = pneg %p1154_p13 }
  0x25   : > { %p1162_p0 = pnand %p1161_p10, %p1155_p9 }
  0x27   : > { %1165 = shalt.err (!%p1162_p0)
}
  0x28   : > { %s1267_s15 = smov 384   ;;  %s1268_s18 = smov 24  }
  0x29   : > { %1068 = dma.hbm_to_vmem [thread:$0]  (!%p1360_p12), %s1636_s1, 2304, %s147_s28, [#allocation9], %s1267_s15, %s1267_s15, %s1268_s18  }
  0x2a   : > { %s1053_s24 = smul.u32 288, %s166_s30  ;;  %s1392_s8 = scalar_lea.hbm %s1635_s0, %s919_s5 }
  0x2b   : > { %s1396_s11 = scalar_lea.sflag [#allocation6], %s166_s30  ;;  %s1166_s29 = scalar_lea.hbm %s1392_s8, 4608 }
  0x2c   : > { %s170_s9 = scalar_lea.vmem [#allocation5], %s1053_s24  ;;  %p1167_p5 = scmp.ne.s32.totalorder %s1392_s8, %s1166_s29 }
  0x2d   : > { %s176_s10 = sshll.u32 %s170_s9, 4  ;;  %p1649_p8 = scmp.ne.s32.totalorder %s1648_s6, 0  ;;  %s1394_s10 = int_to_ptr.vmem [resolvable:$true] %s176_s10 }
  0x2e   : > { %s1171_s12 = scalar_lea.hbm %s1635_s0, 9216  ;;  %p1172_p0 = scmp.lt.u32.totalorder %s1392_s8, %s1635_s0 }
  0x2f   : > { %p1168_p9 = pneg %p1649_p8  ;;  %p1173_p1 = scmp.lt.u32.totalorder %s1171_s12, %s1166_s29 }
  0x30   : > { %p1175_p3 = scmp.lt.u32.totalorder %s1166_s29, %s1392_s8 }
  0x31   : > { %p1169_p10 = pnand %p1168_p9, %p1167_p5  ;;  %p1174_p2 = por %p1173_p1, %p1172_p0 }
  0x33   : > { %p1170_p12 = pneg %p1169_p10  ;;  %p1176_p6 = por %p1175_p3, %p1174_p2 }
  0x35   : > { %p1177_p7 = pnand %p1176_p6, %p1170_p12 }
  0x37   : > { %1180 = shalt.err (!%p1177_p7)
}
  0x38   : > { %s1181_s30 = scalar_lea.vmem %s1394_s10, 4608  ;;  %s1269_s15 = smov [#allocation5]  }
  0x39   : > { %p1182_p4 = scmp.ne.s32.totalorder %s1394_s10, %s1181_s30  ;;  %s1186_s18 = sshll.u32 %s1269_s15, 4  ;;  %s1187_s18 = int_to_ptr.vmem [resolvable:$false] %s1186_s18 }
  0x3a   : > { %s1188_s21 = scalar_lea.vmem %s1187_s18, 9216  ;;  %p1189_p5 = scmp.lt.s32.totalorder %s1394_s10, %s1187_s18 }
  0x3b   : > { %p1184_p11 = pnand %p1182_p4, %p1168_p9  ;;  %p1190_p10 = scmp.lt.s32.totalorder %s1188_s21, %s1181_s30 }
  0x3d   : > { %p1185_p13 = pneg %p1184_p11  ;;  %p1191_p0 = por %p1190_p10, %p1189_p5 }
  0x3f   : > { %p1192_p1 = pnand %p1191_p0, %p1185_p13 }
  0x41   : > { %1195 = shalt.err (!%p1192_p1)
}
  0x42   : > { %s1270_s22 = smov 256   ;;  %s1271_s24 = smov 128  }
  0x43   : > { %s1272_s27 = smov 8   ;;  %p1650_p9 = scmp.ne.s32.totalorder %s1646_s26, 0 }
  0x44   : > { %1072 = dma.hbm_to_vmem [thread:$0]  (!%p1649_p8), %s1392_s8, 4608, %s1394_s10, %s1396_s11, %s1270_s22, %s1271_s24, %s1272_s27  }
  0x45   : > { %188 = sbr.rel (%p1650_p9) target bundleno = 994 (0x3e2), region = 36  ;;  %s190_s7 = sand.u32 (!%p1650_p9), 1, %s1256_s16  }
  0x46   : > { %s1054_s9 = smul.u32 (!%p1650_p9), 288, %s190_s7  ;;  %s191_s29 = scalar_lea.sflag (!%p1650_p9), [#allocation6], %s190_s7 }
  0x47   : > { %p1651_p12 = scmp.ne.s32.totalorder (!%p1650_p9), %s1645_s25, 0 }
  0x48   : > { %s1427_s28 = scalar_lea.vmem (!%p1650_p9), [#allocation5], %s1054_s9 }
  0x4c   : > { %1239 = dma.done.wait (%p1651_p12), %s191_s29, 4608  }
  0x4d   : > { %1241 = vsyncadd (%p1651_p12), %s191_s29, 4294962688  ;;  %p1652_p2 = scmp.eq.s32.totalorder %s1323_s19, 0 }
  0x4f   : > { %1243 = dma.done.wait (%p1652_p2), [#allocation9], 2304   ;;  %p1653_p8 = pmov %p1652_p2 }
  0x50   : > { %v252_v0 = vld [vmem:[%s1427_s28 + $0x80] sm:$0xff]  ;;  %v253_v1 = vld [vmem:[%s1427_s28 + $0x88] sm:$0xff]  ;;  %v254_v5 = vld [vmem:[%s1427_s28 + $0x90] sm:$0xff]  ;;  %vm272_vm0 = vcmask 261120   ;;  %p1654_p3 = scmp.ne.s32.totalorder %s1323_s19, 0 }
  0x51   : > { %1245 = vsyncadd (%p1653_p8), [#allocation9], 4294964992  ;;  %v236_v2 = vld [vmem:[%s1427_s28] sm:$0xff]  ;;  %v1013_v3 = vpack.c.bf16 %v253_v1, %v252_v0  ;;  %v237_v4 = vld [vmem:[%s1427_s28 + $0x8] sm:$0xff]  ;;  %vm485_vm1 = vcmask (!%p1654_p3), 7168  }
  0x52   : > { %v255_v6 = vld [vmem:[%s1427_s28 + $0x98] sm:$0xff]  ;;  %v1015_v7 = vpack.c.bf16 %v237_v4, %v236_v2  ;;  %v238_v9 = vld [vmem:[%s1427_s28 + $0x10] sm:$0xff]  ;;  %v256_v11 = vld [vmem:[%s1427_s28 + $0xa0] sm:$0xff] }
  0x53   : > { %v1017_v8 = vpack.c.bf16 %v255_v6, %v254_v5  ;;  %v239_v10 = vld [vmem:[%s1427_s28 + $0x18] sm:$0xff]  ;;  %1014 = vmatprep.subr.bf16.mxu0 %v1013_v3  ;;  %v257_v12 = vld [vmem:[%s1427_s28 + $0xa8] sm:$0xff]  ;;  %v240_v15 = vld [vmem:[%s1427_s28 + $0x20] sm:$0xff] }
  0x54   : > { %1016 = vmatpush3.bf16.msra.mxu0 %v1015_v7  ;;  %v1019_v13 = vpack.c.bf16 %v239_v10, %v238_v9  ;;  %v1021_v14 = vpack.c.bf16 %v257_v12, %v256_v11  ;;  %v241_v16 = vld [vmem:[%s1427_s28 + $0x28] sm:$0xff]  ;;  %v258_v17 = vld [vmem:[%s1427_s28 + $0xb0] sm:$0xff]  ;;  %v259_v18 = vld [vmem:[%s1427_s28 + $0xb8] sm:$0xff] }
  0x55   : > { %1018 = vmatprep.subr.bf16.mxu0 %v1017_v8  ;;  %v1023_v19 = vpack.c.bf16 %v241_v16, %v240_v15  ;;  %v242_v20 = vld [vmem:[%s1427_s28 + $0x30] sm:$0xff]  ;;  %v1025_v21 = vpack.c.bf16 %v259_v18, %v258_v17  ;;  %v243_v22 = vld [vmem:[%s1427_s28 + $0x38] sm:$0xff]  ;;  %v268_v23 = vld [vmem:[%s1427_s28 + $0x100] sm:$0xff] }
  0x56   : > { %v269_v24 = vld [vmem:[%s1427_s28 + $0x108] sm:$0xff]  ;;  %v260_v25 = vld [vmem:[%s1427_s28 + $0xc0] sm:$0xff]  ;;  %v270_v28 = vld [vmem:[%s1427_s28 + $0x110] sm:$0xff]  ;;  %v1027_v30 = vpack.c.bf16 %v243_v22, %v242_v20 }
  0x57   : > { %v261_v26 = vld [vmem:[%s1427_s28 + $0xc8] sm:$0xff]  ;;  %v1045_v27 = vpack.c.bf16 %v269_v24, %v268_v23  ;;  %v271_v29 = vld [vmem:[%s1427_s28 + $0x118] sm:$0xff]  ;;  %v220_v33 = vld [vmem:[#allocation8 + $0x10] sm:$0xff] }
  0x58   : > { %1020 = vmatpush3.bf16.msra.mxu0 %v1019_v13  ;;  %v1049_v31 = vpack.c.bf16 %v271_v29, %v270_v28  ;;  %v219_v32 = vld [vmem:[#allocation8 + $0x8] sm:$0xff]  ;;  %v1029_v34 = vpack.c.bf16 %v261_v26, %v260_v25  ;;  %v244_v35 = vld [vmem:[%s1427_s28 + $0x40] sm:$0xff]  ;;  %v262_v37 = vld [vmem:[%s1427_s28 + $0xd0] sm:$0xff]  ;;  %1004 = vmatprep.mubr.msk.f32.mxu1 %vm272_vm0, %v220_v33 }
  0x59   : > { %1022 = vmatprep.subr.bf16.mxu0 %v1021_v14  ;;  %1046 = vmatprep.subr.bf16.mxu1 %v1045_v27  ;;  %v245_v36 = vld [vmem:[%s1427_s28 + $0x48] sm:$0xff]  ;;  %v263_v38 = vld [vmem:[%s1427_s28 + $0xd8] sm:$0xff]  ;;  %v246_v41 = vld [vmem:[%s1427_s28 + $0x50] sm:$0xff] }
  0x5a   : > { %1048 = vmatpush3.bf16.msra.mxu1 %v1045_v27  ;;  %355 = vmatprep.mubr.f32.mxu0 %v219_v32  ;;  %v1031_v39 = vpack.c.bf16 %v245_v36, %v244_v35  ;;  %v1033_v40 = vpack.c.bf16 %v263_v38, %v262_v37  ;;  %v247_v42 = vld [vmem:[%s1427_s28 + $0x58] sm:$0xff]  ;;  %v223_v43 = vld [vmem:[#allocation8 + $0x28] sm:$0xff]  ;;  %v264_v44 = vld [vmem:[%s1427_s28 + $0xe0] sm:$0xff]  ;;  %v1273_v38 = vmov (!%p1654_p3), 0.0  }
  0x5b   : > { %1050 = vmatprep.subr.bf16.mxu1 %v1049_v31  ;;  %v265_v45 = vld [vmem:[%s1427_s28 + $0xe8] sm:$0xff]  ;;  %v226_v46 = vld [vmem:[#allocation8 + $0x40] sm:$0xff]  ;;  %v1035_v47 = vpack.c.bf16 %v247_v42, %v246_v41  ;;  %v229_v51 = vld [vmem:[#allocation8 + $0x58] sm:$0xff]  ;;  %486 = vst.msk [vmem:[#allocation2] sm:$0xff] (!%p1654_p3), %vm485_vm1, %v1273_v38 }
  0x5c   : > { %1024 = vmatpush3.bf16.msra.mxu0 %v1023_v19  ;;  %v1037_v48 = vpack.c.bf16 %v265_v45, %v264_v44  ;;  %v248_v49 = vld [vmem:[%s1427_s28 + $0x60] sm:$0xff]  ;;  %v249_v50 = vld [vmem:[%s1427_s28 + $0x68] sm:$0xff]  ;;  %v266_v52 = vld [vmem:[%s1427_s28 + $0xf0] sm:$0xff]  ;;  %487 = vst.msk [vmem:[#allocation2 + $0x8] sm:$0xff] (!%p1654_p3), %vm485_vm1, %v1273_v38 }
  0x5d   : > { %1026 = vmatprep.subr.bf16.mxu0 %v1025_v21  ;;  %v267_v53 = vld [vmem:[%s1427_s28 + $0xf8] sm:$0xff]  ;;  %v232_v54 = vld [vmem:[#allocation8 + $0x70] sm:$0xff]  ;;  %v1039_v55 = vpack.c.bf16 %v249_v50, %v248_v49  ;;  %v235_v59 = vld [vmem:[#allocation8 + $0x88] sm:$0xff]  ;;  %488 = vst.msk [vmem:[#allocation2 + $0x10] sm:$0xff] (!%p1654_p3), %vm485_vm1, %v1273_v38 }
  0x5e   : > { %1052 = vmatpush3.bf16.msra.mxu1 %v1049_v31  ;;  %v1041_v56 = vpack.c.bf16 %v267_v53, %v266_v52  ;;  %v250_v57 = vld [vmem:[%s1427_s28 + $0x70] sm:$0xff]  ;;  %v251_v58 = vld [vmem:[%s1427_s28 + $0x78] sm:$0xff]  ;;  %v218_v61 = vld [vmem:[#allocation8] sm:$0xff]  ;;  %489 = vst.msk [vmem:[#allocation2 + $0x18] sm:$0xff] (!%p1654_p3), %vm485_vm1, %v1273_v38 }
  0x5f   : > { %v1043_v60 = vpack.c.bf16 %v251_v58, %v250_v57  ;;  %v222_v62 = vld [vmem:[#allocation8 + $0x20] sm:$0xff]  ;;  %v221_v63 = vld [vmem:[#allocation8 + $0x18] sm:$0xff]  ;;  %v224_v1 = vld [vmem:[#allocation8 + $0x30] sm:$0xff]  ;;  %490 = vst.msk [vmem:[#allocation2 + $0x20] sm:$0xff] (!%p1654_p3), %vm485_vm1, %v1273_v38 }
  0x60   : > { %1028 = vmatpush3.bf16.msra.mxu0 %v1027_v30  ;;  %v225_v0 = vld [vmem:[#allocation8 + $0x38] sm:$0xff]  ;;  %v228_v2 = vld [vmem:[#allocation8 + $0x50] sm:$0xff]  ;;  %v227_v3 = vld [vmem:[#allocation8 + $0x48] sm:$0xff]  ;;  %491 = vst.msk [vmem:[#allocation2 + $0x28] sm:$0xff] (!%p1654_p3), %vm485_vm1, %v1273_v38 }
  0x61   : > { %1030 = vmatprep.subr.bf16.mxu0 %v1029_v34  ;;  %1005 = vmatmul.mubr.msk.f32.vlgmr.msra.gmra.mrb[0].mxu1 %vm272_vm0, %v223_v43  ;;  %v231_v4 = vld [vmem:[#allocation8 + $0x68] sm:$0xff]  ;;  %v230_v5 = vld [vmem:[#allocation8 + $0x60] sm:$0xff]  ;;  %v233_v7 = vld [vmem:[#allocation8 + $0x78] sm:$0xff]  ;;  %492 = vst.msk [vmem:[#allocation3] sm:$0xff] (!%p1654_p3), %vm485_vm1, %v1273_v38 }
  0x62   : > { %1007 = vmatprep.mubr.msk.f32.mxu1 %vm272_vm0, %v226_v46  ;;  %v234_v6 = vld [vmem:[#allocation8 + $0x80] sm:$0xff]  ;;  %493 = vst.msk [vmem:[#allocation3 + $0x8] sm:$0xff] (!%p1654_p3), %vm485_vm1, %v1273_v38  ;;  %494 = vst.msk [vmem:[#allocation3 + $0x10] sm:$0xff] (!%p1654_p3), %vm485_vm1, %v1273_v38 }
  0x63   : > { %495 = vst.msk [vmem:[#allocation3 + $0x18] sm:$0xff] (!%p1654_p3), %vm485_vm1, %v1273_v38  ;;  %496 = vst.msk [vmem:[#allocation3 + $0x20] sm:$0xff] (!%p1654_p3), %vm485_vm1, %v1273_v38 }
  0x64   : > { %1032 = vmatpush3.bf16.msra.mxu0 %v1031_v39  ;;  %497 = vst.msk [vmem:[#allocation3 + $0x28] sm:$0xff] (!%p1654_p3), %vm485_vm1, %v1273_v38 }
  0x65   : > { %1034 = vmatprep.subr.bf16.mxu0 %v1033_v40  ;;  %1008 = vmatmul.mubr.msk.f32.gmra.mrb[2].mxu1 %vm272_vm0, %v229_v51 }
  0x66   : > { %1010 = vmatprep.mubr.msk.f32.mxu1 %vm272_vm0, %v232_v54 }
  0x68   : > { %1036 = vmatpush3.bf16.msra.mxu0 %v1035_v47 }
  0x69   : > { %1038 = vmatprep.subr.bf16.mxu0 %v1037_v48  ;;  %1011 = vmatmul.mubr.msk.f32.gmra.mrb[4].mxu1 %vm272_vm0, %v235_v59 }
  0x6c   : > { %1040 = vmatpush3.bf16.msra.mxu0 %v1039_v55 }
  0x6d   : > { %1042 = vmatprep.subr.bf16.mxu0 %v1041_v56 }
  0x70   : > { %1044 = vmatpush3.bf16.msra.mxu0 %v1043_v60 }
  0x73   : > { %356 = vmatmul.mubr.f32.vlgmr.msra.gmra.mrb[0].mxu0 %v218_v61 }
  0x74   : > { %360 = vmatprep.mubr.f32.mxu0 %v222_v62 }
  0x77   : > { %361 = vmatmul.mubr.f32.gmra.mrb[2].mxu0 %v221_v63 }
  0x78   : > { %365 = vmatprep.mubr.f32.mxu0 %v225_v0 }
  0x7b   : > { %366 = vmatmul.mubr.f32.gmra.mrb[4].mxu0 %v224_v1 }
  0x7c   : > { %370 = vmatprep.mubr.f32.mxu0 %v228_v2 }
  0x7f   : > { %371 = vmatmul.mubr.f32.gmra.mrb[6].mxu0 %v227_v3 }
  0x80   : > { %375 = vmatprep.mubr.f32.mxu0 %v231_v4 }
  0x83   : > { %376 = vmatmul.mubr.f32.gmra.mrb[8].mxu0 %v230_v5 }
  0x84   : > { %380 = vmatprep.mubr.f32.mxu0 %v234_v6 }
  0x87   : > { %381 = vmatmul.mubr.f32.gmra.mrb[10].mxu0 %v233_v7 }
 0x134   : > { %v1006_v8 = vpop.f32.mrb[0].mxu1 }
 0x135   : > { %v452_v9 = vpop.f32.mrb[1].mxu1 }
 0x138   : > { %v1009_v10 = vpop.f32.mrb[2].mxu1 }
 0x139   : > { %v462_v11 = vpop.f32.mrb[3].mxu1 }
 0x13c   : > { %v1012_v12 = vpop.f32.mrb[4].mxu1 }
 0x13d   : > { %v472_v13 = vpop.f32.mrb[5].mxu1 }
 0x146   : > { %v968_v14 = vpop.f32.mrb[0].mxu0 }
 0x147   : > { %v969_v15 = vpop.f32.mrb[1].mxu0 }
 0x148   : > { %v970_v16 = vadd.f32 %v969_v15, %v968_v14 }
 0x14a   : > { %v1479_v17 = vadd.f32 %v970_v16, %v452_v9  ;;  %v971_v18 = vpop.f32.mrb[2].mxu0 }
 0x14b   : > { %v972_v19 = vpop.f32.mrb[3].mxu0 }
 0x14c   : > { %v973_v20 = vadd.f32 %v972_v19, %v971_v18  ;;  %498 = vadd.xlane.f32.xlu0 (!%p1654_p3), %v1479_v17 }
 0x14e   : > { %v1481_v21 = vadd.f32 %v1006_v8, %v973_v20  ;;  %v974_v22 = vpop.f32.mrb[4].mxu0 }
 0x14f   : > { %v975_v23 = vpop.f32.mrb[5].mxu0 }
 0x150   : > { %v976_v24 = vadd.f32 %v975_v23, %v974_v22  ;;  %500 = vadd.xlane.f32.xlu0 (!%p1654_p3), %v1481_v21 }
 0x152   : > { %v1483_v25 = vadd.f32 %v976_v24, %v462_v11  ;;  %v977_v26 = vpop.f32.mrb[6].mxu0 }
 0x153   : > { %v978_v27 = vpop.f32.mrb[7].mxu0 }
 0x154   : > { %v979_v28 = vadd.f32 %v978_v27, %v977_v26  ;;  %502 = vadd.xlane.f32.xlu1 (!%p1654_p3), %v1483_v25 }
 0x156   : > { %v1485_v29 = vadd.f32 %v1009_v10, %v979_v28  ;;  %v980_v30 = vpop.f32.mrb[8].mxu0 }
 0x157   : > { %v981_v31 = vpop.f32.mrb[9].mxu0 }
 0x158   : > { %v982_v32 = vadd.f32 %v981_v31, %v980_v30  ;;  %484 = sbr.rel (%p1654_p3) target bundleno = 497 (0x1f1), region = 48  ;;  %504 = vadd.xlane.f32.xlu1 (!%p1654_p3), %v1485_v29 }
 0x15a   : > { %v1487_v33 = vadd.f32 %v982_v32, %v472_v13  ;;  %v983_v34 = vpop.f32.mrb[10].mxu0 }
 0x15b   : > { %v984_v35 = vpop.f32.mrb[11].mxu0 }
 0x15c   : > { %v985_v36 = vadd.f32 %v984_v35, %v983_v34  ;;  %506 = vadd.xlane.f32.xlu0 (!%p1654_p3), %v1487_v33 }
 0x15e   : > { %v1489_v37 = vadd.f32 %v1012_v12, %v985_v36 }
 0x160   : > { %508 = vadd.xlane.f32.xlu1 %v1489_v37 }
 0x1d9   : > { %v499_v40 = vpop.xlane.xlu0 %498 }
 0x1da   : > { %v510_v42 = vmul.f32 0.0078125, %v499_v40 }
 0x1dc   : > { %516 = vst.msk [vmem:[#allocation4] sm:$0xff] %vm485_vm1, %v510_v42 }
 0x1dd   : > { %v501_v44 = vpop.xlane.xlu0 %500 }
 0x1de   : > { %v511_v46 = vmul.f32 0.0078125, %v501_v44 }
 0x1e0   : > { %517 = vst.msk [vmem:[#allocation4 + $0x8] sm:$0xff] %vm485_vm1, %v511_v46 }
 0x1e1   : > { %v503_v39 = vpop.xlane.xlu1 %502 }
 0x1e2   : > { %v512_v41 = vmul.f32 0.0078125, %v503_v39 }
 0x1e4   : > { %518 = vst.msk [vmem:[#allocation4 + $0x10] sm:$0xff] %vm485_vm1, %v512_v41 }
 0x1e5   : > { %v505_v43 = vpop.xlane.xlu1 %504 }
 0x1e6   : > { %v513_v45 = vmul.f32 0.0078125, %v505_v43 }
 0x1e8   : > { %519 = vst.msk [vmem:[#allocation4 + $0x18] sm:$0xff] %vm485_vm1, %v513_v45 }
 0x1e9   : > { %v507_v48 = vpop.xlane.xlu0 %506 }
 0x1ea   : > { %v514_v50 = vmul.f32 0.0078125, %v507_v48 }
 0x1ec   : > { %520 = vst.msk [vmem:[#allocation4 + $0x20] sm:$0xff] %vm485_vm1, %v514_v50 }
 0x1ed   : > { %v509_v47 = vpop.xlane.xlu1 %508 }
 0x1ee   : > { %v515_v49 = vmul.f32 0.0078125, %v509_v47 }
 0x1f0   : > { %521 = vst.msk [vmem:[#allocation4 + $0x28] sm:$0xff] %vm485_vm1, %v515_v49 }
 0x1f1 PF: > { %v535_v51 = vld [vmem:[#allocation4 + $0x10] sm:$0xff]  ;;  %v533_v52 = vld [vmem:[#allocation4] sm:$0xff]  ;;  %v1274_v53 = vmov 0   ;;  %v536_v54 = vld [vmem:[#allocation4 + $0x18] sm:$0xff]  ;;  %s929_s25 = sshll.u32 %s1323_s19, 7  ;;  %vm599_vm2 = vcmask 7168  }
 0x1f2   : > { %1123 = vset.pattern.permute.xlu1 %v1274_v53  ;;  %1122 = vset.pattern.permute.xlu0 %v1274_v53  ;;  %v534_v55 = vld [vmem:[#allocation4 + $0x8] sm:$0xff]  ;;  %s523_s26 = sshra.s32 %s929_s25, 7  ;;  %v575_v12 = vld [vmem:[#allocation2] sm:$0xff]  ;;  %v577_v16 = vld [vmem:[#allocation2 + $0x10] sm:$0xff]  ;;  %p931_p6 = scmp.ne.s32.totalorder %s1323_s19, 1 }
 0x1f3   : > { %551 = vperm.xlu1 %1123, %v535_v51   ;;  %541 = vperm.xlu0 %1122, %v533_v52   ;;  %v537_v57 = vld [vmem:[#allocation4 + $0x20] sm:$0xff]  ;;  %s930_s6 = sshll.u32 %s523_s26, 3  ;;  %v576_v15 = vld [vmem:[#allocation2 + $0x8] sm:$0xff]  ;;  %v578_v22 = vld [vmem:[#allocation2 + $0x18] sm:$0xff]  ;;  %v1275_v50 = vmov (!%p931_p6), 0  }
 0x1f4   : > { %s526_s8 = scalar_lea.vmem [#allocation10], %s930_s6  ;;  %v606_v27 = vld [vmem:[#allocation3] sm:$0xff]  ;;  %v580_v28 = vld [vmem:[#allocation2 + $0x28] sm:$0xff]  ;;  %v607_v34 = vld [vmem:[#allocation3 + $0x8] sm:$0xff] }
 0x1f5   : > { %527 = vst [vmem:[%s526_s8] sm:$0xff] %v1479_v17  ;;  %528 = vst [vmem:[%s526_s8 + $0x10] sm:$0xff] %v1481_v21  ;;  %v610_v39 = vld [vmem:[#allocation3 + $0x20] sm:$0xff]  ;;  %v609_v40 = vld [vmem:[#allocation3 + $0x18] sm:$0xff] }
 0x1f6   : > { %529 = vst [vmem:[%s526_s8 + $0x20] sm:$0xff] %v1483_v25  ;;  %530 = vst [vmem:[%s526_s8 + $0x30] sm:$0xff] %v1485_v29  ;;  %v611_v45 = vld [vmem:[#allocation3 + $0x28] sm:$0xff] }
 0x1f7   : > { %556 = vperm.xlu1 %1123, %v536_v54   ;;  %546 = vperm.xlu0 %1122, %v534_v55   ;;  %v538_v56 = vld [vmem:[#allocation4 + $0x28] sm:$0xff]  ;;  %531 = vst [vmem:[%s526_s8 + $0x40] sm:$0xff] %v1487_v33  ;;  %532 = vst [vmem:[%s526_s8 + $0x50] sm:$0xff] %v1489_v37 }
 0x1fb   : > { %566 = vperm.xlu1 %1123, %v538_v56   ;;  %561 = vperm.xlu0 %1122, %v537_v57  }
 0x1ff   : > { %1125 = vset.pattern.permute.xlu1 (!%p931_p6), %v1275_v50  ;;  %1124 = vset.pattern.permute.xlu0 (!%p931_p6), %v1275_v50 }
 0x272   : > { %v552_v58 = vpop.permute.xlu1 %551  ;;  %v542_v59 = vpop.permute.xlu0 %541 }
 0x273   : > { %v569_v60 = vsub.f32 %v1479_v17, %v542_v59  ;;  %v571_v61 = vsub.f32 %v1483_v25, %v552_v58 }
 0x275   : > { %581 = vadd.xlane.f32.xlu0 %v569_v60  ;;  %v612_v6 = vmul.f32 %v569_v60, %v569_v60  ;;  %v614_v8 = vmul.f32 %v571_v61, %v571_v61 }
 0x276   : > { %v557_v62 = vpop.permute.xlu1 %556  ;;  %v547_v63 = vpop.permute.xlu0 %546 }
 0x277   : > { %v570_v0 = vsub.f32 %v1481_v21, %v547_v63  ;;  %v572_v2 = vsub.f32 %v1485_v29, %v557_v62  ;;  %v579_v21 = vld [vmem:[#allocation2 + $0x20] sm:$0xff] }
 0x279   : > { %585 = vadd.xlane.f32.xlu0 %v571_v61  ;;  %583 = vadd.xlane.f32.xlu1 %v570_v0  ;;  %v613_v7 = vmul.f32 %v570_v0, %v570_v0  ;;  %v615_v9 = vmul.f32 %v572_v2, %v572_v2 }
 0x27a   : > { %v562_v1 = vpop.permute.xlu0 %561  ;;  %v567_v4 = vpop.permute.xlu1 %566 }
 0x27b   : > { %v573_v3 = vsub.f32 %v1487_v33, %v562_v1  ;;  %v574_v5 = vsub.f32 %v1489_v37, %v567_v4  ;;  %v608_v33 = vld [vmem:[#allocation3 + $0x10] sm:$0xff] }
 0x27d   : > { %587 = vadd.xlane.f32.xlu0 %v572_v2  ;;  %589 = vadd.xlane.f32.xlu1 %v573_v3  ;;  %v616_v10 = vmul.f32 %v573_v3, %v573_v3  ;;  %v617_v11 = vmul.f32 %v574_v5, %v574_v5 }
 0x281   : > { %591 = vadd.xlane.f32.xlu0 %v574_v5  ;;  %618 = vadd.xlane.f32.xlu1 %v612_v6 }
 0x285   : > { %620 = vadd.xlane.f32.xlu0 %v613_v7  ;;  %622 = vadd.xlane.f32.xlu1 %v614_v8 }
 0x289   : > { %624 = vadd.xlane.f32.xlu0 %v615_v9  ;;  %626 = vadd.xlane.f32.xlu1 %v616_v10 }
 0x28d   : > { %628 = vadd.xlane.f32.xlu0 %v617_v11 }
 0x302   : > { %v582_v13 = vpop.xlane.xlu0 %581 }
 0x303   : > { %v593_v14 = vadd.f32 %v582_v13, %v575_v12 }
 0x305   : > { %600 = vst.msk [vmem:[#allocation2] sm:$0xff] %vm599_vm2, %v593_v14 }
 0x306   : > { %v584_v18 = vpop.xlane.xlu1 %583  ;;  %v586_v17 = vpop.xlane.xlu0 %585 }
 0x307   : > { %v594_v19 = vadd.f32 %v584_v18, %v576_v15  ;;  %v595_v20 = vadd.f32 %v586_v17, %v577_v16 }
 0x309   : > { %601 = vst.msk [vmem:[#allocation2 + $0x8] sm:$0xff] %vm599_vm2, %v594_v19  ;;  %602 = vst.msk [vmem:[#allocation2 + $0x10] sm:$0xff] %vm599_vm2, %v595_v20 }
 0x30a   : > { %v590_v23 = vpop.xlane.xlu1 %589  ;;  %v588_v24 = vpop.xlane.xlu0 %587 }
 0x30b   : > { %v597_v25 = vadd.f32 %v590_v23, %v579_v21  ;;  %v596_v26 = vadd.f32 %v588_v24, %v578_v22 }
 0x30c   : > { %v646_v53 = vld [vmem:[#allocation2] sm:$0xff] (!%p931_p6) }
 0x30d   : > { %604 = vst.msk [vmem:[#allocation2 + $0x20] sm:$0xff] %vm599_vm2, %v597_v25  ;;  %603 = vst.msk [vmem:[#allocation2 + $0x18] sm:$0xff] %vm599_vm2, %v596_v26  ;;  %v652_v54 = vmul.f32 (!%p931_p6), 0.00390625, %v646_v53 }
 0x30e   : > { %v619_v29 = vpop.xlane.xlu1 %618  ;;  %v592_v30 = vpop.xlane.xlu0 %591 }
 0x30f   : > { %v630_v31 = vadd.f32 %v619_v29, %v606_v27  ;;  %v598_v32 = vadd.f32 %v592_v30, %v580_v28  ;;  %v682_v62 = vmul.f32 (!%p931_p6), %v652_v54, %v652_v54  ;;  %v696_v27 = vld [vmem:[%s1637_s2 + $0x10] sm:$0xff] (!%p931_p6)  ;;  %v694_v28 = vld [vmem:[%s1637_s2] sm:$0xff] (!%p931_p6)  ;;  %v697_v30 = vld [vmem:[%s1637_s2 + $0x18] sm:$0xff] (!%p931_p6) }
 0x310   : > { %v648_v48 = vld [vmem:[#allocation2 + $0x10] sm:$0xff] (!%p931_p6)  ;;  %v647_v61 = vld [vmem:[#allocation2 + $0x8] sm:$0xff] (!%p931_p6) }
 0x311   : > { %636 = vst.msk [vmem:[#allocation3] sm:$0xff] %vm599_vm2, %v630_v31  ;;  %605 = vst.msk [vmem:[#allocation2 + $0x28] sm:$0xff] %vm599_vm2, %v598_v32  ;;  %v1543_v51 = vmul.f32 (!%p931_p6), 0.00390625, %v648_v48  ;;  %v653_v0 = vmul.f32 (!%p931_p6), 0.00390625, %v647_v61  ;;  %v659_v31 = vld [vmem:[#allocation4 + $0x8] sm:$0xff] (!%p931_p6)  ;;  %v698_v48 = vld [vmem:[%s1637_s2 + $0x20] sm:$0xff] (!%p931_p6) }
 0x312   : > { %v623_v35 = vpop.xlane.xlu1 %622  ;;  %v621_v36 = vpop.xlane.xlu0 %620 }
 0x313   : > { %v632_v37 = vadd.f32 %v623_v35, %v608_v33  ;;  %v631_v38 = vadd.f32 %v621_v36, %v607_v34  ;;  %v684_v57 = vmul.f32 (!%p931_p6), %v1543_v51, %v1543_v51  ;;  %v683_v10 = vmul.f32 (!%p931_p6), %v653_v0, %v653_v0  ;;  %v658_v34 = vld [vmem:[#allocation4] sm:$0xff] (!%p931_p6)  ;;  %v695_v35 = vld [vmem:[%s1637_s2 + $0x8] sm:$0xff] (!%p931_p6) }
 0x314   : > { %v649_v56 = vld [vmem:[#allocation2 + $0x18] sm:$0xff] (!%p931_p6)  ;;  %v650_v8 = vld [vmem:[#allocation2 + $0x20] sm:$0xff] (!%p931_p6) }
 0x315   : > { %638 = vst.msk [vmem:[#allocation3 + $0x10] sm:$0xff] %vm599_vm2, %v632_v37  ;;  %637 = vst.msk [vmem:[#allocation3 + $0x8] sm:$0xff] %vm599_vm2, %v631_v38  ;;  %v1547_v59 = vmul.f32 (!%p931_p6), 0.00390625, %v649_v56  ;;  %v1553_v12 = vmul.f32 (!%p931_p6), 0.00390625, %v650_v8  ;;  %v719_v56 = vld [vmem:[%s1638_s3 + $0x8] sm:$0xff] (!%p931_p6)  ;;  %v722_v8 = vld [vmem:[%s1638_s3 + $0x20] sm:$0xff] (!%p931_p6) }
 0x316   : > { %v627_v41 = vpop.xlane.xlu1 %626  ;;  %v625_v42 = vpop.xlane.xlu0 %624 }
 0x317   : > { %v634_v43 = vadd.f32 %v627_v41, %v610_v39  ;;  %v633_v44 = vadd.f32 %v625_v42, %v609_v40  ;;  %645 = sbr.rel (%p931_p6) target bundleno = 968 (0x3c8), region = 52  ;;  %v685_v4 = vmul.f32 (!%p931_p6), %v1547_v59, %v1547_v59  ;;  %v686_v20 = vmul.f32 (!%p931_p6), %v1553_v12, %v1553_v12 }
 0x318   : > { %v670_v55 = vld [vmem:[#allocation3] sm:$0xff] (!%p931_p6)  ;;  %v651_v2 = vld [vmem:[#allocation2 + $0x28] sm:$0xff] (!%p931_p6)  ;;  %v665_v40 = vadd.f32 (!%p931_p6), %v659_v31, %v653_v0  ;;  %v664_v42 = vadd.f32 (!%p931_p6), %v658_v34, %v652_v54  ;;  %v721_v0 = vld [vmem:[%s1638_s3 + $0x18] sm:$0xff] (!%p931_p6) }
 0x319   : > { %640 = vst.msk [vmem:[#allocation3 + $0x20] sm:$0xff] %vm599_vm2, %v634_v43  ;;  %639 = vst.msk [vmem:[#allocation3 + $0x18] sm:$0xff] %vm599_vm2, %v633_v44  ;;  %v676_v58 = vmul.f32 (!%p931_p6), 0.00390625, %v670_v55  ;;  %v1551_v6 = vmul.f32 (!%p931_p6), 0.00390625, %v651_v2  ;;  %v699_v44 = vld [vmem:[%s1637_s2 + $0x28] sm:$0xff] (!%p931_p6)  ;;  %v720_v2 = vld [vmem:[%s1638_s3 + $0x10] sm:$0xff] (!%p931_p6) }
 0x31a   : > { %v629_v46 = vpop.xlane.xlu0 %628 }
 0x31b   : > { %v635_v47 = vadd.f32 %v629_v46, %v611_v45  ;;  %v688_v9 = vsub.f32 (!%p931_p6), %v676_v58, %v682_v62  ;;  %v687_v16 = vmul.f32 (!%p931_p6), %v1551_v6, %v1551_v6  ;;  %v661_v45 = vld [vmem:[#allocation4 + $0x18] sm:$0xff] (!%p931_p6)  ;;  %v718_v58 = vld [vmem:[%s1638_s3] sm:$0xff] (!%p931_p6) }
 0x31c   : > { %v672_v49 = vld [vmem:[#allocation3 + $0x10] sm:$0xff] (!%p931_p6)  ;;  %v671_v1 = vld [vmem:[#allocation3 + $0x8] sm:$0xff] (!%p931_p6) }
 0x31d   : > { %641 = vst.msk [vmem:[#allocation3 + $0x28] sm:$0xff] %vm599_vm2, %v635_v47  ;;  %v678_v52 = vmul.f32 (!%p931_p6), 0.00390625, %v672_v49  ;;  %v677_v5 = vmul.f32 (!%p931_p6), 0.00390625, %v671_v1  ;;  %v700_v17 = vadd.f32 (!%p931_p6), 0.001, %v688_v9  ;;  %v660_v47 = vld [vmem:[#allocation4 + $0x10] sm:$0xff] (!%p931_p6) }
 0x31e   : > { %v666_v53 = vadd.f32 %v660_v47, %v1543_v51 }
 0x31f   : > { %v690_v3 = vsub.f32 %v678_v52, %v684_v57  ;;  %v689_v19 = vsub.f32 %v677_v5, %v683_v10  ;;  %v667_v52 = vadd.f32 %v661_v45, %v1547_v59  ;;  %v663_v57 = vld [vmem:[#allocation4 + $0x28] sm:$0xff] }
 0x320   : > { %v673_v60 = vld [vmem:[#allocation3 + $0x18] sm:$0xff]  ;;  %v674_v13 = vld [vmem:[#allocation3 + $0x20] sm:$0xff]  ;;  %v669_v59 = vadd.f32 %v663_v57, %v1551_v6 }
 0x321   : > { %v679_v63 = vmul.f32 0.00390625, %v673_v60  ;;  %v702_v14 = vadd.f32 0.001, %v690_v3  ;;  %v680_v18 = vmul.f32 0.00390625, %v674_v13  ;;  %v701_v23 = vadd.f32 0.001, %v689_v19 }
 0x322   : > { %v662_v60 = vld [vmem:[#allocation4 + $0x20] sm:$0xff]  ;;  %v723_v6 = vld [vmem:[%s1638_s3 + $0x28] sm:$0xff] }
 0x323   : > { %v691_v15 = vsub.f32 %v679_v63, %v685_v4  ;;  %1126 = vrsqrt.f32 %v702_v14  ;;  %v692_v24 = vsub.f32 %v680_v18, %v686_v20  ;;  %v668_v1 = vadd.f32 %v662_v60, %v1553_v12  ;;  %v737_v19 = vld [vmem:[#allocation10 + $0x8] sm:$0xff] }
 0x324   : > { %v675_v7 = vld [vmem:[#allocation3 + $0x28] sm:$0xff]  ;;  %1128 = vrsqrt.f32 %v700_v17  ;;  %v736_v17 = vld [vmem:[#allocation10] sm:$0xff] }
 0x325   : > { %v681_v11 = vmul.f32 0.00390625, %v675_v7  ;;  %v703_v21 = vadd.f32 0.001, %v691_v15  ;;  %v704_v26 = vadd.f32 0.001, %v692_v24  ;;  %v738_v15 = vld [vmem:[#allocation10 + $0x10] sm:$0xff] }
 0x327   : > { %v693_v22 = vsub.f32 %v681_v11, %v687_v16  ;;  %1130 = vrsqrt.f32 %v703_v21  ;;  %v739_v16 = vld [vmem:[#allocation10 + $0x18] sm:$0xff] }
 0x328   : > { %1132 = vrsqrt.f32 %v701_v23 }
 0x329   : > { %v705_v25 = vadd.f32 0.001, %v693_v22 }
 0x32b   : > { %1134 = vrsqrt.f32 %v705_v25  ;;  %v742_v25 = vld [vmem:[#allocation10 + $0x30] sm:$0xff] }
 0x32c   : > { %1136 = vrsqrt.f32 %v704_v26  ;;  %v743_v26 = vld [vmem:[#allocation10 + $0x38] sm:$0xff] }
 0x32d   : > { %v1127_v29 = vpop.eup %1126 }
 0x32e   : > { %v1129_v32 = vpop.eup %1128  ;;  %v714_v33 = vmul.f32 %v1127_v29, %v696_v27  ;;  %v741_v29 = vld [vmem:[#allocation10 + $0x28] sm:$0xff] }
 0x32f   : > { %v712_v37 = vmul.f32 %v1129_v32, %v694_v28  ;;  %v740_v28 = vld [vmem:[#allocation10 + $0x20] sm:$0xff] }
 0x330   : > { %760 = vperm.xlu1 %1125, %v714_v33   ;;  %v726_v63 = vmul.f32 %v714_v33, %v666_v53 }
 0x331   : > { %v1131_v36 = vpop.eup %1130  ;;  %750 = vperm.xlu0 %1124, %v712_v37   ;;  %v724_v54 = vmul.f32 %v712_v37, %v664_v42  ;;  %v744_v42 = vld [vmem:[#allocation10 + $0x40] sm:$0xff] }
 0x332   : > { %v1133_v38 = vpop.eup %1132  ;;  %v715_v39 = vmul.f32 %v1131_v36, %v697_v30  ;;  %v732_v5 = vsub.f32 %v720_v2, %v726_v63 }
 0x333   : > { %v713_v43 = vmul.f32 %v1133_v38, %v695_v35  ;;  %v730_v51 = vsub.f32 %v718_v58, %v724_v54 }
 0x334   : > { %765 = vperm.xlu1 %1125, %v715_v39   ;;  %v727_v62 = vmul.f32 %v715_v39, %v667_v52  ;;  %v746_v39 = vld [vmem:[#allocation10 + $0x50] sm:$0xff] }
 0x335   : > { %v1135_v41 = vpop.eup %1134  ;;  %v725_v50 = vmul.f32 %v713_v43, %v665_v40  ;;  %755 = vperm.xlu0 %1124, %v713_v43   ;;  %v747_v40 = vld [vmem:[#allocation10 + $0x58] sm:$0xff]  ;;  %v745_v43 = vld [vmem:[#allocation10 + $0x48] sm:$0xff] }
 0x336   : > { %v1137_v46 = vpop.eup %1136  ;;  %v717_v49 = vmul.f32 %v1135_v41, %v699_v44  ;;  %v733_v3 = vsub.f32 %v721_v0, %v727_v62 }
 0x337   : > { %v716_v55 = vmul.f32 %v1137_v46, %v698_v48  ;;  %v731_v61 = vsub.f32 %v719_v56, %v725_v50 }
 0x338   : > { %775 = vperm.xlu1 %1125, %v717_v49   ;;  %v729_v4 = vmul.f32 %v717_v49, %v669_v59 }
 0x339   : > { %770 = vperm.xlu0 %1124, %v716_v55   ;;  %v728_v7 = vmul.f32 %v716_v55, %v668_v1 }
 0x33a   : > { %v735_v9 = vsub.f32 %v723_v6, %v729_v4 }
 0x33b   : > { %v734_v10 = vsub.f32 %v722_v8, %v728_v7 }
 0x33c   : > { %797 = vperm.xlu1 %1125, %v731_v61  }
 0x33d   : > { %792 = vperm.xlu0 %1124, %v730_v51  }
 0x340   : > { %807 = vperm.xlu1 %1125, %v733_v3  }
 0x341   : > { %802 = vperm.xlu0 %1124, %v732_v5  }
 0x344   : > { %817 = vperm.xlu1 %1125, %v735_v9  }
 0x345   : > { %812 = vperm.xlu0 %1124, %v734_v10  }
 0x3af   : > { %v761_v11 = vpop.permute.xlu1 %760 }
 0x3b0   : > { %v751_v12 = vpop.permute.xlu0 %750  ;;  %v782_v37 = vmul.f32 %v761_v11, %v740_v28  ;;  %v783_v38 = vmul.f32 %v761_v11, %v741_v29 }
 0x3b1   : > { %v778_v23 = vmul.f32 %v751_v12, %v736_v17  ;;  %v779_v24 = vmul.f32 %v751_v12, %v737_v19 }
 0x3b3   : > { %v766_v13 = vpop.permute.xlu1 %765 }
 0x3b4   : > { %v756_v14 = vpop.permute.xlu0 %755  ;;  %v784_v35 = vmul.f32 %v766_v13, %v742_v25  ;;  %v785_v36 = vmul.f32 %v766_v13, %v743_v26 }
 0x3b5   : > { %v780_v21 = vmul.f32 %v756_v14, %v738_v15  ;;  %v781_v22 = vmul.f32 %v756_v14, %v739_v16 }
 0x3b7   : > { %v776_v18 = vpop.permute.xlu1 %775 }
 0x3b8   : > { %v771_v20 = vpop.permute.xlu0 %770  ;;  %v788_v49 = vmul.f32 %v776_v18, %v746_v39  ;;  %v789_v50 = vmul.f32 %v776_v18, %v747_v40 }
 0x3b9   : > { %v786_v52 = vmul.f32 %v771_v20, %v744_v42  ;;  %v787_v53 = vmul.f32 %v771_v20, %v745_v43 }
 0x3bb   : > { %v798_v27 = vpop.permute.xlu1 %797 }
 0x3bc   : > { %v822_v30 = vadd.f32 %v798_v27, %v780_v21  ;;  %v823_v31 = vadd.f32 %v798_v27, %v781_v22  ;;  %v793_v32 = vpop.permute.xlu0 %792 }
 0x3bd   : > { %v820_v33 = vadd.f32 %v793_v32, %v778_v23  ;;  %v821_v34 = vadd.f32 %v793_v32, %v779_v24 }
 0x3be   : > { %834 = vst [vmem:[#allocation10 + $0x10] sm:$0xff] %v822_v30  ;;  %835 = vst [vmem:[#allocation10 + $0x18] sm:$0xff] %v823_v31 }
 0x3bf   : > { %832 = vst [vmem:[#allocation10] sm:$0xff] %v820_v33  ;;  %833 = vst [vmem:[#allocation10 + $0x8] sm:$0xff] %v821_v34  ;;  %v808_v41 = vpop.permute.xlu1 %807 }
 0x3c0   : > { %v826_v44 = vadd.f32 %v808_v41, %v784_v35  ;;  %v827_v45 = vadd.f32 %v808_v41, %v785_v36  ;;  %v803_v46 = vpop.permute.xlu0 %802 }
 0x3c1   : > { %v824_v47 = vadd.f32 %v803_v46, %v782_v37  ;;  %v825_v48 = vadd.f32 %v803_v46, %v783_v38 }
 0x3c2   : > { %838 = vst [vmem:[#allocation10 + $0x30] sm:$0xff] %v826_v44  ;;  %839 = vst [vmem:[#allocation10 + $0x38] sm:$0xff] %v827_v45 }
 0x3c3   : > { %836 = vst [vmem:[#allocation10 + $0x20] sm:$0xff] %v824_v47  ;;  %837 = vst [vmem:[#allocation10 + $0x28] sm:$0xff] %v825_v48  ;;  %v818_v54 = vpop.permute.xlu1 %817 }
 0x3c4   : > { %v830_v55 = vadd.f32 %v818_v54, %v788_v49  ;;  %v831_v56 = vadd.f32 %v818_v54, %v789_v50  ;;  %v813_v57 = vpop.permute.xlu0 %812 }
 0x3c5   : > { %v828_v58 = vadd.f32 %v813_v57, %v786_v52  ;;  %v829_v60 = vadd.f32 %v813_v57, %v787_v53 }
 0x3c6   : > { %842 = vst [vmem:[#allocation10 + $0x50] sm:$0xff] %v830_v55  ;;  %843 = vst [vmem:[#allocation10 + $0x58] sm:$0xff] %v831_v56 }
 0x3c7   : > { %840 = vst [vmem:[#allocation10 + $0x40] sm:$0xff] %v828_v58  ;;  %841 = vst [vmem:[#allocation10 + $0x48] sm:$0xff] %v829_v60 }
 0x3c8 PF: > { %p1076_p7 = scmp.eq.s32.totalorder %s1323_s19, 1  ;;  %s1276_s12 = smov [#allocation10]  }
 0x3c9   : > { %s850_s13 = sshll.u32 %s1276_s12, 4  ;;  %s851_s13 = int_to_ptr.vmem [resolvable:$true] %s850_s13 }
 0x3ca   : > { %s1196_s14 = scalar_lea.vmem %s851_s13, 1536  ;;  %p1203_p5 = scmp.lt.s32.totalorder %s851_s13, %s851_s13 }
 0x3cb   : > { %p1197_p4 = scmp.ne.s32.totalorder %s851_s13, %s1196_s14  ;;  %p1204_p10 = scmp.lt.s32.totalorder %s1196_s14, %s1196_s14 }
 0x3cd   : > { %p1198_p11 = pnand %p1197_p4, %p1076_p7  ;;  %p1205_p0 = por %p1204_p10, %p1203_p5 }
 0x3cf   : > { %p1199_p13 = pneg %p1198_p11 }
 0x3d1   : > { %p1206_p1 = pnand %p1205_p0, %p1199_p13 }
 0x3d3   : > { %1209 = shalt.err (!%p1206_p1)
}
 0x3d4   : > { %s1210_s18 = scalar_lea.hbm %s1639_s4, 1536 }
 0x3d5   : > { %p1211_p9 = scmp.ne.s32.totalorder %s1639_s4, %s1210_s18  ;;  %p1216_p8 = scmp.lt.u32.totalorder %s1210_s18, %s1639_s4 }
 0x3d7   : > { %p1212_p12 = pnand %p1211_p9, %p1076_p7 }
 0x3d9   : > { %p1213_p2 = pneg %p1212_p12 }
 0x3db   : > { %p1218_p3 = pnand %p1216_p8, %p1213_p2 }
 0x3dd   : > { %1221 = shalt.err (!%p1218_p3)
}
 0x3de   : > { %s1277_s7 = smov 256   ;;  %s1278_s9 = smov 16  }
 0x3df   : > { %1062 = dma.vmem_to_hbm [thread:$0]  (%p1076_p7), %s851_s13, 1536, %s1639_s4, [#allocation7], %s1277_s7, %s1277_s7, %s1278_s9  }
 0x3e0   : > { %1247 = dma.done.wait (%p1076_p7), [#allocation7], 1536  }
 0x3e1   : > { %1249 = vsyncadd (%p1076_p7), [#allocation7], 4294965760 }
 0x3e2 PF: > { %p16_p6 = scmp.ge.s32.totalorder %s1326_s20, 4   ;;  %s1655_s15 = smov %s1256_s16 }
 0x3e3   : > { %s1656_s16 = smov %s1260_s17  ;;  %s1657_s17 = smov %s1336_s23 }
 0x3e4   : > { %s1658_s18 = smov %s1326_s20  ;;  %18 = sbr.rel (!%p16_p6) target bundleno = 5 (0x5), region = 86 }
 0x3eb   :  { %866 = vsyncpa [#allocation6], 1 }
 0x3ec   :  { %868 = vsyncpa [#allocation6 + $0x1], 1 }
 0x3ed   :  { %869 = vsyncpa [#allocation9], 1 }
 0x3ee   :  { %870 = vsyncpa [#allocation7], 1 }
 0x3ef   :  { %872 = vsyncpa [#allocation7 + $0x1], 1 }

</bundles_post_ra>
